<compile_context>
chip_gen: v6e
topology: v6e:2x2x1
jax: 0.10.0
libtpu: 0.0.40
codegen_flags: <defaults>
</compile_context>

<pallas_src>
import jax
import jax.numpy as jnp
from jax.experimental import pallas as pl
from jax.experimental.pallas import tpu as pltpu

_LANE = 128                      # lane width
_CHUNK = 2048                    # in-kernel lane chunk (x chunk = 16*2048*4B = 128 KiB)
_VMEM_LIMIT = 32 * 1024 * 1024   # raised above v5e's 16 MiB scoped default


def _round_up(n, m):
    return -(-n // m) * m


def _dqn_kernel(m_ref, b_ref, x_ref, o_ref):
    """Block-diagonal Linear(4,2) + ReLU on one sublane-packed batch tile.

    m_ref: VMEM [8, 16]  kron(I4, W) -- per-quarter block-diagonal weights (f32)
    b_ref: VMEM [8, 1]   bias, replicated once per batch quarter (f32)
    x_ref: VMEM [16, tb] 4 batch quarters x 4 features on sublanes, batch on lanes
    o_ref: VMEM [8, tb]  4 batch quarters x 2 outputs on sublanes, batch on lanes
    """
    tb = x_ref.shape[1]
    c = tb if tb <= _CHUNK else _CHUNK        # static; tb % c == 0 by construction
    m = m_ref[...]
    # Hoisted broadcast (JAX does not CSE broadcast_in_dim inside the loop).
    bias = jnp.broadcast_to(b_ref[...], (o_ref.shape[0], c))
    for k in range(tb // c):                  # static unroll; stores keep live ranges short
        xc = x_ref[:, pl.ds(k * c, c)].astype(jnp.float32)
        yc = jnp.dot(m, xc, preferred_element_type=jnp.float32) + bias
        o_ref[:, pl.ds(k * c, c)] = jnp.maximum(yc, 0.0).astype(o_ref.dtype)


def _tile_budget_lanes():
    """Max lane tile, from a VMEM budget for the double-buffered x + out blocks."""
    budget = 12 * 1024 * 1024                 # safe inside every generation's scoped VMEM
    try:
        cap = getattr(pltpu.get_tpu_info(), "vmem_capacity_bytes", 0) or 0
        if cap:                                # 128 MiB on v5e/v6e, 64 MiB on v7x
            budget = min(max(cap // 8, 4 * 1024 * 1024), 16 * 1024 * 1024)
    except Exception:
        pass
    per_lane = (16 + 8) * 4 * 2               # f32 x + out blocks, double buffered
    return max(_CHUNK, (budget // per_lane) // _CHUNK * _CHUNK)


def _pick_tile(b4, tb_max):
    """Lane tile over quarter-batch space (multiple of 128; of _CHUNK when > _CHUNK)."""
    if b4 <= _CHUNK:
        return _round_up(b4, _LANE)
    tb = min(tb_max, _round_up(b4, _CHUNK))
    if _round_up(b4, tb) // tb < 2:
        # Keep >= 2 grid steps so v7x's two TensorCores both get work.
        tb = _round_up(-(-b4 // 2), _CHUNK)
    return tb


def _dqn_packed_call(x_packed, m, bias8, tb):
    """x_packed: [16, Bq] (Bq % tb == 0) -> packed output [8, Bq]."""
    _, bq = x_packed.shape
    num_tiles = bq // tb
    itemsize = jnp.dtype(x_packed.dtype).itemsize
    bytes_acc = (16 + 8) * bq * itemsize + (8 * 16 + 8) * 4
    return pl.pallas_call(
        _dqn_kernel,
        out_shape=jax.ShapeDtypeStruct((8, bq), x_packed.dtype),
        grid=(num_tiles,),
        in_specs=[
            pl.BlockSpec((8, 16), lambda i: (0, 0)),    # kron(I4, W): tiny, refetched per step
            pl.BlockSpec((8, 1), lambda i: (0, 0)),     # bias (per-quarter replicated)
            pl.BlockSpec((16, tb), lambda i: (0, i)),   # packed x lane tiles
        ],
        out_specs=pl.BlockSpec((8, tb), lambda i: (0, i)),
        compiler_params=pltpu.CompilerParams(
            dimension_semantics=("parallel",),          # batch tiles are independent
            vmem_limit_bytes=_VMEM_LIMIT),
        cost_estimate=pl.CostEstimate(
            flops=2 * 8 * 16 * bq, transcendentals=0, bytes_accessed=int(bytes_acc)),
    )(m, bias8, x_packed)


def dqn_forward(x, w, b, *, min_pallas_batch=1024, tb_max=None):
    """x: [B, 4], w: [2, 4] (PyTorch layout), b: [2] -> relu(x @ w.T + b), shape [B, 2]."""
    B, in_f = x.shape
    out_f, in_f_w = w.shape
    assert in_f == in_f_w == 4 and out_f == 2

    if B < min_pallas_batch:
        # Acting-path batches: dispatch + packing would dominate; let XLA fuse it.
        return jnp.maximum(x @ w.T.astype(x.dtype) + b.astype(x.dtype), 0.0)

    if tb_max is None:
        tb_max = _tile_budget_lanes()
    b4 = -(-B // 4)                       # quarter-batch length (lanes)
    tb = _pick_tile(b4, tb_max)
    bq = _round_up(b4, tb)
    total = 4 * bq

    # Pack [B, 4] -> [16, Bq]: quarter q (samples [q*Bq, (q+1)*Bq)) -> sublanes 4q..4q+3.
    x_full = jnp.pad(x, ((0, total - B), (0, 0))) if total != B else x
    x_packed = x_full.reshape(4, bq, in_f).transpose(0, 2, 1).reshape(4 * in_f, bq)

    m = jnp.kron(jnp.eye(4, dtype=jnp.float32), w.astype(jnp.float32))   # [8, 16]
    bias8 = jnp.tile(b.astype(jnp.float32), 4).reshape(4 * out_f, 1)     # [8, 1]

    o_packed = _dqn_packed_call(x_packed, m, bias8, tb)

    # Unpack [8, Bq] -> [B, 2].  Padded lanes hold relu(b); they are sliced off here,
    # so only the returned [B, 2] view is valid for downstream consumers.
    y = o_packed.reshape(4, out_f, bq).transpose(0, 2, 1).reshape(total, out_f)
    return y[:B]


def init_params(key, in_features=4, out_features=2, dtype=jnp.float32):
    # PyTorch nn.Linear default init: U(-1/sqrt(in), 1/sqrt(in)).
    kw, kb = jax.random.split(key)
    bound = 1.0 / (in_features ** 0.5)
    w = jax.random.uniform(kw, (out_features, in_features),
                           minval=-bound, maxval=bound, dtype=dtype)
    b = jax.random.uniform(kb, (out_features,),
                           minval=-bound, maxval=bound, dtype=dtype)
    return w, b


if __name__ == "__main__":
    key = jax.random.PRNGKey(0)
    kx, kp, kx2 = jax.random.split(key, 3)
    w, b = init_params(kp)

    # Module-scale shape (batch=2, in=4): default path takes the fused-XLA fallback.
    B = 2
    x = jax.random.normal(kx, (B, 4), dtype=jnp.float32)
    ref = jnp.maximum(x @ w.T + b, 0.0)
    out = jax.block_until_ready(dqn_forward(x, w, b))
    assert out.shape == (B, 2)
    assert jnp.allclose(out, ref, atol=1e-5), "mismatch vs reference (B=2, fallback)"

    # Force the Pallas path at the same tiny shape (single 128-lane packed tile).
    out_p = jax.block_until_ready(dqn_forward(x, w, b, min_pallas_batch=0))
    assert out_p.shape == (B, 2)
    assert jnp.allclose(out_p, ref, atol=1e-4), "mismatch vs reference (B=2, pallas)"

    # Replay-buffer sized ragged batch: multi-tile grid, multi-chunk inner loop,
    # and a padded tail that must be sliced off correctly.
    B2 = 40000
    x2 = jax.random.normal(kx2, (B2, 4), dtype=jnp.float32)
    out2 = jax.block_until_ready(dqn_forward(x2, w, b))
    ref2 = jnp.maximum(x2 @ w.T + b, 0.0)
    assert out2.shape == (B2, 2)
    assert jnp.allclose(out2, ref2, atol=1e-4), "mismatch vs reference (B=40000, pallas)"

    print("KERNEL_OK")
</pallas_src>

<mosaic_0001>
module attributes {stable_mosaic.version = 11 : i64} {
  func.func @_dqn_kernel(%arg0: i32, %arg1: memref<8x16xf32, #tpu.memory_space<vmem>>, %arg2: memref<8x1xf32, #tpu.memory_space<vmem>>, %arg3: memref<16x128xf32, #tpu.memory_space<vmem>>, %arg4: memref<8x128xf32, #tpu.memory_space<vmem>>) attributes {dimension_semantics = [#tpu.dimension_semantics<parallel>], iteration_bounds = array<i64: 1>, scalar_prefetch = 0 : i64, scratch_operands = 0 : i64, tpu.core_type = #tpu.core_type<tc>, window_params = [{pipeline_mode = #tpu.pipeline_mode<synchronous>, transform_indices = @transform_0, window_bounds = array<i64: 8, 16>}, {pipeline_mode = #tpu.pipeline_mode<synchronous>, transform_indices = @transform_1, window_bounds = array<i64: 8, 1>}, {transform_indices = @transform_2, window_bounds = array<i64: 16, 128>}, {transform_indices = @transform_3, window_bounds = array<i64: 8, 128>}]} {
    %c0 = arith.constant 0 : index
    %c0_0 = arith.constant 0 : index
    %0 = vector.load %arg1[%c0, %c0_0] : memref<8x16xf32, #tpu.memory_space<vmem>>, vector<8x16xf32>
    %c0_1 = arith.constant 0 : index
    %c0_2 = arith.constant 0 : index
    %1 = vector.load %arg2[%c0_1, %c0_2] : memref<8x1xf32, #tpu.memory_space<vmem>>, vector<8x1xf32>
    %2 = vector.shape_cast %1 : vector<8x1xf32> to vector<8x1xf32>
    %3 = vector.broadcast %2 : vector<8x1xf32> to vector<8x128xf32>
    %c0_3 = arith.constant 0 : index
    %c0_4 = arith.constant 0 : index
    %4 = vector.load %arg3[%c0_3, %c0_4] : memref<16x128xf32, #tpu.memory_space<vmem>>, vector<16x128xf32>
    %cst = arith.constant dense<0.000000e+00> : vector<8x128xf32>
    %5 = tpu.matmul %0, %4, %cst {dimension_numbers = #tpu.dot_dimension_numbers<[1], [0], [0], [1], [0, 0, 1, 1], [], []>} : vector<8x16xf32>, vector<16x128xf32>, vector<8x128xf32> -> vector<8x128xf32>
    %6 = arith.addf %5, %3 : vector<8x128xf32>
    %cst_5 = arith.constant 0.000000e+00 : f32
    %7 = vector.broadcast %cst_5 : f32 to vector<8x128xf32>
    %8 = arith.maximumf %6, %7 : vector<8x128xf32>
    %c0_6 = arith.constant 0 : index
    %c0_7 = arith.constant 0 : index
    %9 = vector.load %arg4[%c0_6, %c0_7] : memref<8x128xf32, #tpu.memory_space<vmem>>, vector<8x128xf32>
    tpu.vector_store %arg4[%c0_6, %c0_7], %8 {strides = array<i32>} : memref<8x128xf32, #tpu.memory_space<vmem>>, vector<8x128xf32>,
    return
  }
  func.func @transform_0(%arg0: i32) -> (i32, i32) {
    %c0_i32 = arith.constant 0 : i32
    %c0_i32_0 = arith.constant 0 : i32
    %c0_i32_1 = arith.constant 0 : i32
    return %c0_i32, %c0_i32_0 : i32, i32
  }
  func.func @transform_1(%arg0: i32) -> (i32, i32) {
    %c0_i32 = arith.constant 0 : i32
    %c0_i32_0 = arith.constant 0 : i32
    %c0_i32_1 = arith.constant 0 : i32
    return %c0_i32, %c0_i32_0 : i32, i32
  }
  func.func @transform_2(%arg0: i32) -> (i32, i32) {
    %c0_i32 = arith.constant 0 : i32
    %c0_i32_0 = arith.constant 0 : i32
    return %c0_i32, %arg0 : i32, i32
  }
  func.func @transform_3(%arg0: i32) -> (i32, i32) {
    %c0_i32 = arith.constant 0 : i32
    %c0_i32_0 = arith.constant 0 : i32
    return %c0_i32, %arg0 : i32, i32
  }
}

</mosaic_0001>

<bundles_post_ra>
// kernel: tpu_custom_call.1
= control target key start
LH: loop header
LB: loop body
LE: loop exit
PB: predicated region body
PF: predicated region fallthrough
CT: control target
= control target key end

     0   :  { %8 = vsyncpa [#allocation3], 0  ;;  %s231_s0 = inlined_call_operand.vmem [shape: f32[8,16], index: 0, kind: input, shape index: {}]   ;;  %s232_s1 = inlined_call_operand.vmem [shape: f32[8,1], index: 1, kind: input, shape index: {}]   ;;  %s233_s2 = inlined_call_operand.hbm [shape: f32[16,128], index: 2, kind: input, shape index: {}]   ;;  %s234_s3 = inlined_call_operand.hbm [shape: f32[8,128], index: 3, kind: output, shape index: {}]  }
   0x1   :  { %9 = vsyncpa [#allocation4], 0  ;;  %s192_s12 = smov [#allocation2]  }
   0x2   :  { %s19_s13 = sshll.u32 %s192_s12, 4  ;;  %s20_s13 = int_to_ptr.vmem [resolvable:$true] %s19_s13 }
   0x3   :  { %s156_s14 = scalar_lea.vmem %s20_s13, 256  ;;  %p161_p1 = scmp.lt.s32.totalorder %s20_s13, %s20_s13 }
   0x4   :  { %p157_p0 = scmp.ne.s32.totalorder %s20_s13, %s156_s14  ;;  %p162_p2 = scmp.lt.s32.totalorder %s156_s14, %s156_s14 }
   0x6   :  { %p163_p3 = por %p162_p2, %p161_p1 }
   0x8   :  { %p164_p4 = pnand %p163_p3, %p157_p0 }
   0xa   :  { %167 = shalt.err (!%p164_p4)
}
   0xb   :  { %s193_s15 = smov 128   ;;  %s194_s16 = smov 8  }
   0xc   :  { %25 = dma.hbm_to_vmem [thread:$0]  %s233_s2, 256, %s20_s13, [#allocation3], %s193_s15, %s193_s15, %s194_s16  }
   0xd   :  { %188 = dma.done.wait [#allocation3], 256  }
   0xe   :  { %189 = vsyncadd [#allocation3], 4294967040  ;;  %v195_v0 = vmov 0.0   ;;  %vm196_vm0 = vmmov 0   ;;  %v197_v1 = vmov 0   ;;  %v37_v2 = vld [vmem:[#allocation2 + $0x8] sm:$0xff] }
   0xf   :  { %133 = vmatprep.subr.mxu0 %v195_v0  ;;  %137 = vmatprep.mubr.msk.f32.mxu0 %vm196_vm0, %v195_v0  ;;  %v36_v3 = vld [vmem:[#allocation2] sm:$0xff]  ;;  %vm38_vm1 = vcmask 130048   ;;  %s198_s2 = smov [#allocation5]  }
  0x10   :  { %147 = vset.pattern.permute.xlu0 %v197_v1  ;;  %134 = vmatpush3.msra.mxu0 %v37_v2  ;;  %v29_v4 = vld [vmem:[%s231_s0] sm:$0xff]  ;;  %s120_s23 = sshll.u32 %s198_s2, 4  ;;  %s121_s23 = int_to_ptr.vmem [resolvable:$true] %s120_s23 }
  0x11   :  { %v30_v5 = vld [vmem:[%s232_s1] sm:$0xff]  ;;  %135 = vmatprep.subr.mxu0 %v195_v0  ;;  %s168_s24 = scalar_lea.vmem %s121_s23, 128  ;;  %p173_p6 = scmp.lt.s32.totalorder %s121_s23, %s121_s23 }
  0x12   :  { %33 = vperm.xlu0 %147, %v30_v5   ;;  %136 = vmatpush3.msra.mxu0 %v36_v3  ;;  %p169_p5 = scmp.ne.s32.totalorder %s121_s23, %s168_s24  ;;  %p174_p7 = scmp.lt.s32.totalorder %s168_s24, %s168_s24 }
  0x13   :  { %138 = vmatmul.mubr.msk.f32.vlgmr.msra.gmra.mxu0 %vm38_vm1, %v29_v4 }
  0x14   :  { %p175_p8 = por %p174_p7, %p173_p6 }
  0x16   :  { %p176_p9 = pnand %p175_p8, %p169_p5 }
  0x8d   :  { %v34_v6 = vpop.permute.xlu0 %33 }
  0xd3   :  { %v108_v7 = vpop.f32.mrf.mxu0 }
  0xd4   :  { %v109_v8 = vadd.f32 %v108_v7, %v34_v6 }
  0xd5   :  { %v139_v9 = vpop.f32.mrf.mxu0 }
  0xd6   :  { %v112_v10 = vmax.f32 %v109_v8, 0.0 }
  0xd8   :  { %113 = vst [vmem:[#allocation5] sm:$0xff] %v112_v10 }
  0xd9   :  { %179 = shalt.err (!%p176_p9)
}
  0xda   :  { %123 = dma.vmem_to_hbm [thread:$0]  %s121_s23, 128, %s234_s3, [#allocation4]  }
  0xdb   :  { %190 = dma.done.wait [#allocation4], 128  }
  0xdc   :  { %191 = vsyncadd [#allocation4], 4294967168 }
  0xdd   :  { %127 = vsyncpa [#allocation3], 1 }
  0xde   :  { %128 = vsyncpa [#allocation4], 1 }

</bundles_post_ra>
